<compile_context>
chip_gen: v7x
topology: tpu7x:2x2x1
jax: 0.10.0
libtpu: 0.0.40
codegen_flags: <defaults>
</compile_context>

<pallas_src>
import functools

import jax
import jax.numpy as jnp
from jax import lax
from jax.experimental import pallas as pl
from jax.experimental.pallas import tpu as pltpu


def convblock_kernel(x_ref, w_ref, b_ref, alpha_ref, o_ref, col_ref,
                     *, H, W, KH, KW, padding):
    """Fused 3x3 conv (stride 1, zero pad) + bias + PReLU for NB images per grid step.

    x_ref    : (NB, Cin_p, L)  input, lane-dense (L = H*W on lanes), Cin padded to 8, VMEM
    w_ref    : (Cout, K)       weights, row k = (kh*KW + kw)*Cin_p + ci, VMEM
    b_ref    : (Cout, 1)       bias, f32, VMEM (added in the f32 epilogue)
    alpha_ref: (1,)            PReLU slope (num_parameters=1), SMEM
    o_ref    : (NB, Cout, L)   output, lane-dense, VMEM
    col_ref  : (K, NB*L)       scratch: im2col matrix (fully rewritten every grid step)
    """
    NB, Cin_p, L = x_ref.shape

    # Halo masks, one per tap, hoisted out of the image loop (lane iota built once).
    lane = lax.broadcasted_iota(jnp.int32, (1, L), 1)
    lane_w = lane % W                                    # column coordinate of each lane
    masks = {}
    for kh in range(KH):
        dh = kh - padding
        for kw in range(KW):
            dw = kw - padding
            valid = None
            if dh < 0:
                valid = lane >= (-dh) * W                # rows rolled in from above the image
            elif dh > 0:
                valid = lane < (H - dh) * W              # rows rolled in from below the image
            if dw < 0:
                cv = lane_w >= -dw                       # columns wrapped from the previous row
                valid = cv if valid is None else valid & cv
            elif dw > 0:
                cv = lane_w < (W - dw)                   # columns wrapped from the next row
                valid = cv if valid is None else valid & cv
            if valid is not None:
                masks[(kh, kw)] = valid

    # im2col via XLU rolls + VPU masks: tap(dh,dw)[ci, p] = x[ci, p + dh*W + dw], 0 in the halo.
    for nb in range(NB):
        x_nb = x_ref[nb]                                 # (Cin_p, L): one vector load per image
        for kh in range(KH):
            for kw in range(KW):
                off = (kh - padding) * W + (kw - padding)
                tap = x_nb if off == 0 else pltpu.roll(x_nb, shift=(-off) % L, axis=1)
                m = masks.get((kh, kw))
                if m is not None:
                    tap = jnp.where(m, tap, jnp.zeros_like(tap))
                k = kh * KW + kw
                # Full-sublane (multiple-of-8 rows), lane-aligned (L % 128 == 0) unmasked store.
                col_ref[k * Cin_p:(k + 1) * Cin_p, nb * L:(nb + 1) * L] = tap

    # Single MXU matmul over all NB images: (Cout, K) @ (K, NB*L) with f32 accumulation.
    y = jnp.dot(w_ref[...], col_ref[...], preferred_element_type=jnp.float32)

    # f32 epilogue: bias add (never quantized through the MXU) + PReLU with scalar alpha.
    y = y + b_ref[...].astype(jnp.float32)
    alpha = alpha_ref[0]
    y = jnp.where(y > 0, y, alpha * y)

    for nb in range(NB):                                 # unmasked, lane-dense output stores
        o_ref[nb] = y[:, nb * L:(nb + 1) * L].astype(o_ref.dtype)


def conv_block_forward(x_nchw, w_oihw, bias, alpha,
                       kernel_size=3, stride=1, padding=1, images_per_step=None):
    """Mirrors ConvBlock.forward with defaults (norm=None, pad_model=None, activation='prelu')."""
    assert stride == 1 and kernel_size == 3 and padding == 1, \
        "this kernel implements the ConvBlock defaults (3x3, stride 1, pad 1)"
    N, Cin, H, W = x_nchw.shape
    Cout = w_oihw.shape[0]
    KH = KW = kernel_size
    L = H * W
    SUB = 8
    Cin_p = -(-Cin // SUB) * SUB                  # channels padded to a sublane multiple
    K = KH * KW * Cin_p
    dtype = x_nchw.dtype
    itemsize = jnp.dtype(dtype).itemsize

    # Images per grid step: amortize per-step overhead and the MXU weight push, but keep >= 2
    # grid steps (v7x: two TensorCores) and keep per-image im2col lane offsets 128-aligned.
    if images_per_step is None:
        NB = 1
        if L % 128 == 0:
            for cand in (8, 4, 2):
                if N % cand == 0 and N // cand >= 2 and cand * L * K * itemsize <= 8 * 1024 * 1024:
                    NB = cand
                    break
    else:
        NB = images_per_step
    assert N % NB == 0, "images_per_step must divide the batch"

    # Zero-pad channels to Cin_p (and the matching weight rows) so every im2col store is a full
    # (8,128) tile; NCHW -> (N, Cin_p, H*W) stays a contiguous view (no transpose pass).
    x_flat = jnp.pad(x_nchw, ((0, 0), (0, Cin_p - Cin), (0, 0), (0, 0))).reshape(N, Cin_p, L)
    w_mat = jnp.pad(jnp.transpose(w_oihw, (0, 2, 3, 1)),          # (Cout, KH, KW, Cin_p)
                    ((0, 0), (0, 0), (0, 0), (0, Cin_p - Cin))).reshape(Cout, K).astype(dtype)
    bias_col = jnp.asarray(bias, jnp.float32).reshape(Cout, 1)    # kept f32: epilogue add
    alpha_arr = jnp.full((1,), alpha, jnp.float32)

    kernel = functools.partial(convblock_kernel, H=H, W=W, KH=KH, KW=KW, padding=padding)
    out_flat = pl.pallas_call(
        kernel,
        out_shape=jax.ShapeDtypeStruct((N, Cout, L), dtype),
        grid=(N // NB,),
        in_specs=[
            pl.BlockSpec((NB, Cin_p, L), lambda g: (g, 0, 0)),
            pl.BlockSpec((Cout, K), lambda g: (0, 0)),
            pl.BlockSpec((Cout, 1), lambda g: (0, 0)),
            pl.BlockSpec(memory_space=pltpu.MemorySpace.SMEM),    # PReLU alpha: scalar path
        ],
        out_specs=pl.BlockSpec((NB, Cout, L), lambda g: (g, 0, 0)),
        scratch_shapes=[pltpu.VMEM((K, NB * L), dtype)],          # im2col matrix
        compiler_params=pltpu.CompilerParams(
            dimension_semantics=("parallel",)),                   # batch split over TCs (v7x)
    )(x_flat, w_mat, bias_col, alpha_arr)

    # TODO(synk): for SR-scale shapes (C~64, H=W>=256) add an H-tile grid axis with a 1-row halo
    # (overlapping-row index_map or a small manual halo DMA), stage x/w/col in bf16 with the f32
    # epilogue above, set CompilerParams(vmem_limit_bytes=...) for the larger tiles, and raise
    # the x in_spec to pipeline_mode=pl.Buffered(3) if the input DMA is exposed.
    # TODO(synk): v5e variant: if the single vst slot saturates on the im2col write, replace the
    # materialized col matrix with 9 accumulated (Cout,Cin_p)@(Cin_p,L) matmuls on on-the-fly taps.
    return out_flat.reshape(N, Cout, H, W)


def _reference(x_nchw, w_oihw, bias, alpha, padding=1):
    # Pure-JAX reference for a silent correctness check.
    y = lax.conv_general_dilated(
        x_nchw, w_oihw, window_strides=(1, 1),
        padding=((padding, padding), (padding, padding)),
        dimension_numbers=("NCHW", "OIHW", "NCHW"))
    y = y + bias.reshape(1, -1, 1, 1)
    return jnp.where(y > 0, y, alpha * y)


if __name__ == "__main__":
    key = jax.random.PRNGKey(0)
    kx, kwt, kb = jax.random.split(key, 3)

    N, Cin, H, W = 4, 4, 16, 16     # input_size = 4 (N=4 exercises NB=2 batching, grid=(2,))
    Cout = 8                        # output_size = 8
    alpha = 0.5                     # PReLU(init=0.5)

    x = jax.random.normal(kx, (N, Cin, H, W), jnp.float32)
    w = jax.random.normal(kwt, (Cout, Cin, 3, 3), jnp.float32) * 0.1   # deterministic synthetic init
    b = jax.random.normal(kb, (Cout,), jnp.float32) * 0.1

    out = conv_block_forward(x, w, b, alpha)
    out = jax.block_until_ready(out)

    ref = _reference(x, w, b, alpha)
    assert out.shape == (N, Cout, H, W)
    assert jnp.allclose(out, ref, atol=1e-4, rtol=1e-4)

    print("KERNEL_OK")
</pallas_src>

<mosaic_0001>
module attributes {stable_mosaic.version = 11 : i64} {
  func.func @convblock_kernel(%arg0: i32, %arg1: memref<2x8x256xf32, #tpu.memory_space<vmem>>, %arg2: memref<8x72xf32, #tpu.memory_space<vmem>>, %arg3: memref<8x1xf32, #tpu.memory_space<vmem>>, %arg4: memref<1xf32, #tpu.memory_space<smem>>, %arg5: memref<2x8x256xf32, #tpu.memory_space<vmem>>, %arg6: memref<72x512xf32, #tpu.memory_space<vmem>>) attributes {dimension_semantics = [#tpu.dimension_semantics<parallel>], iteration_bounds = array<i64: 2>, scalar_prefetch = 0 : i64, scratch_operands = 1 : i64, tpu.core_type = #tpu.core_type<tc>, window_params = [{transform_indices = @transform_0, window_bounds = array<i64: 2, 8, 256>}, {pipeline_mode = #tpu.pipeline_mode<synchronous>, transform_indices = @transform_1, window_bounds = array<i64: 8, 72>}, {pipeline_mode = #tpu.pipeline_mode<synchronous>, transform_indices = @transform_2, window_bounds = array<i64: 8, 1>}, {transform_indices = @transform_3, window_bounds = array<i64: 1>}, {transform_indices = @transform_4, window_bounds = array<i64: 2, 8, 256>}]} {
    %0 = tpu.iota {dimensions = array<i32: 1>} : vector<1x256xi32>
    %c16_i32 = arith.constant 16 : i32
    %c0_i32 = arith.constant 0 : i32
    %1 = arith.cmpi eq, %c16_i32, %c0_i32 : i32
    %c1_i32 = arith.constant 1 : i32
    %2 = arith.select %1, %c1_i32, %c16_i32 : i32
    %3 = vector.broadcast %2 : i32 to vector<1x256xi32>
    %4 = arith.remsi %0, %3 : vector<1x256xi32>
    %c0_i32_0 = arith.constant 0 : i32
    %5 = vector.broadcast %c0_i32_0 : i32 to vector<1x256xi32>
    %6 = arith.cmpi ne, %4, %5 : vector<1x256xi32>
    %c0_i32_1 = arith.constant 0 : i32
    %7 = vector.broadcast %c0_i32_1 : i32 to vector<1x256xi32>
    %8 = arith.cmpi slt, %4, %7 : vector<1x256xi32>
    %c0_i32_2 = arith.constant 0 : i32
    %9 = arith.cmpi slt, %2, %c0_i32_2 : i32
    %10 = vector.broadcast %9 : i1 to vector<1x256xi1>
    %11 = vector.broadcast %10 : vector<1x256xi1> to vector<1x256xi1>
    %12 = arith.xori %8, %11 : vector<1x256xi1>
    %13 = arith.andi %12, %6 : vector<1x256xi1>
    %14 = vector.broadcast %2 : i32 to vector<1x256xi32>
    %15 = arith.addi %4, %14 : vector<1x256xi32>
    %16 = arith.select %13, %15, %4 : vector<1x256xi1>, vector<1x256xi32>
    %c16_i32_3 = arith.constant 16 : i32
    %17 = vector.broadcast %c16_i32_3 : i32 to vector<1x256xi32>
    %18 = arith.cmpi sge, %0, %17 : vector<1x256xi32>
    %c1_i32_4 = arith.constant 1 : i32
    %19 = vector.broadcast %c1_i32_4 : i32 to vector<1x256xi32>
    %20 = arith.cmpi sge, %16, %19 : vector<1x256xi32>
    %21 = arith.andi %18, %20 : vector<1x256xi1>
    %c16_i32_5 = arith.constant 16 : i32
    %22 = vector.broadcast %c16_i32_5 : i32 to vector<1x256xi32>
    %23 = arith.cmpi sge, %0, %22 : vector<1x256xi32>
    %c16_i32_6 = arith.constant 16 : i32
    %24 = vector.broadcast %c16_i32_6 : i32 to vector<1x256xi32>
    %25 = arith.cmpi sge, %0, %24 : vector<1x256xi32>
    %c15_i32 = arith.constant 15 : i32
    %26 = vector.broadcast %c15_i32 : i32 to vector<1x256xi32>
    %27 = arith.cmpi slt, %16, %26 : vector<1x256xi32>
    %28 = arith.andi %25, %27 : vector<1x256xi1>
    %c1_i32_7 = arith.constant 1 : i32
    %29 = vector.broadcast %c1_i32_7 : i32 to vector<1x256xi32>
    %30 = arith.cmpi sge, %16, %29 : vector<1x256xi32>
    %c15_i32_8 = arith.constant 15 : i32
    %31 = vector.broadcast %c15_i32_8 : i32 to vector<1x256xi32>
    %32 = arith.cmpi slt, %16, %31 : vector<1x256xi32>
    %c240_i32 = arith.constant 240 : i32
    %33 = vector.broadcast %c240_i32 : i32 to vector<1x256xi32>
    %34 = arith.cmpi slt, %0, %33 : vector<1x256xi32>
    %c1_i32_9 = arith.constant 1 : i32
    %35 = vector.broadcast %c1_i32_9 : i32 to vector<1x256xi32>
    %36 = arith.cmpi sge, %16, %35 : vector<1x256xi32>
    %37 = arith.andi %34, %36 : vector<1x256xi1>
    %c240_i32_10 = arith.constant 240 : i32
    %38 = vector.broadcast %c240_i32_10 : i32 to vector<1x256xi32>
    %39 = arith.cmpi slt, %0, %38 : vector<1x256xi32>
    %c240_i32_11 = arith.constant 240 : i32
    %40 = vector.broadcast %c240_i32_11 : i32 to vector<1x256xi32>
    %41 = arith.cmpi slt, %0, %40 : vector<1x256xi32>
    %c15_i32_12 = arith.constant 15 : i32
    %42 = vector.broadcast %c15_i32_12 : i32 to vector<1x256xi32>
    %43 = arith.cmpi slt, %16, %42 : vector<1x256xi32>
    %44 = arith.andi %41, %43 : vector<1x256xi1>
    %c0 = arith.constant 0 : index
    %c0_13 = arith.constant 0 : index
    %c0_14 = arith.constant 0 : index
    %45 = vector.load %arg1[%c0, %c0_13, %c0_14] : memref<2x8x256xf32, #tpu.memory_space<vmem>>, vector<1x8x256xf32>
    %46 = vector.shape_cast %45 : vector<1x8x256xf32> to vector<8x256xf32>
    %c17_i32 = arith.constant 17 : i32
    %47 = tpu.dynamic_rotate %46 by %c17_i32 dim 1 : vector<8x256xf32>, i32 -> vector<8x256xf32>
    %cst = arith.constant 0.000000e+00 : f32
    %48 = vector.broadcast %cst : f32 to vector<8x256xf32>
    %49 = vector.shape_cast %21 : vector<1x256xi1> to vector<1x256xi1>
    %50 = vector.broadcast %49 : vector<1x256xi1> to vector<8x256xi1>
    %51 = arith.select %50, %47, %48 : vector<8x256xi1>, vector<8x256xf32>
    %c0_15 = arith.constant 0 : index
    %c0_16 = arith.constant 0 : index
    %52 = vector.load %arg6[%c0_15, %c0_16] : memref<72x512xf32, #tpu.memory_space<vmem>>, vector<8x256xf32>
    tpu.vector_store %arg6[%c0_15, %c0_16], %51 {strides = array<i32>} : memref<72x512xf32, #tpu.memory_space<vmem>>, vector<8x256xf32>,
    %c16_i32_17 = arith.constant 16 : i32
    %53 = tpu.dynamic_rotate %46 by %c16_i32_17 dim 1 : vector<8x256xf32>, i32 -> vector<8x256xf32>
    %cst_18 = arith.constant 0.000000e+00 : f32
    %54 = vector.broadcast %cst_18 : f32 to vector<8x256xf32>
    %55 = vector.shape_cast %23 : vector<1x256xi1> to vector<1x256xi1>
    %56 = vector.broadcast %55 : vector<1x256xi1> to vector<8x256xi1>
    %57 = arith.select %56, %53, %54 : vector<8x256xi1>, vector<8x256xf32>
    %c8 = arith.constant 8 : index
    %c0_19 = arith.constant 0 : index
    %58 = vector.load %arg6[%c8, %c0_19] : memref<72x512xf32, #tpu.memory_space<vmem>>, vector<8x256xf32>
    tpu.vector_store %arg6[%c8, %c0_19], %57 {strides = array<i32>} : memref<72x512xf32, #tpu.memory_space<vmem>>, vector<8x256xf32>,
    %c15_i32_20 = arith.constant 15 : i32
    %59 = tpu.dynamic_rotate %46 by %c15_i32_20 dim 1 : vector<8x256xf32>, i32 -> vector<8x256xf32>
    %cst_21 = arith.constant 0.000000e+00 : f32
    %60 = vector.broadcast %cst_21 : f32 to vector<8x256xf32>
    %61 = vector.shape_cast %28 : vector<1x256xi1> to vector<1x256xi1>
    %62 = vector.broadcast %61 : vector<1x256xi1> to vector<8x256xi1>
    %63 = arith.select %62, %59, %60 : vector<8x256xi1>, vector<8x256xf32>
    %c16 = arith.constant 16 : index
    %c0_22 = arith.constant 0 : index
    %64 = vector.load %arg6[%c16, %c0_22] : memref<72x512xf32, #tpu.memory_space<vmem>>, vector<8x256xf32>
    tpu.vector_store %arg6[%c16, %c0_22], %63 {strides = array<i32>} : memref<72x512xf32, #tpu.memory_space<vmem>>, vector<8x256xf32>,
    %c1_i32_23 = arith.constant 1 : i32
    %65 = tpu.dynamic_rotate %46 by %c1_i32_23 dim 1 : vector<8x256xf32>, i32 -> vector<8x256xf32>
    %cst_24 = arith.constant 0.000000e+00 : f32
    %66 = vector.broadcast %cst_24 : f32 to vector<8x256xf32>
    %67 = vector.shape_cast %30 : vector<1x256xi1> to vector<1x256xi1>
    %68 = vector.broadcast %67 : vector<1x256xi1> to vector<8x256xi1>
    %69 = arith.select %68, %65, %66 : vector<8x256xi1>, vector<8x256xf32>
    %c24 = arith.constant 24 : index
    %c0_25 = arith.constant 0 : index
    %70 = vector.load %arg6[%c24, %c0_25] : memref<72x512xf32, #tpu.memory_space<vmem>>, vector<8x256xf32>
    tpu.vector_store %arg6[%c24, %c0_25], %69 {strides = array<i32>} : memref<72x512xf32, #tpu.memory_space<vmem>>, vector<8x256xf32>,
    %c32 = arith.constant 32 : index
    %c0_26 = arith.constant 0 : index
    %71 = vector.load %arg6[%c32, %c0_26] : memref<72x512xf32, #tpu.memory_space<vmem>>, vector<8x256xf32>
    tpu.vector_store %arg6[%c32, %c0_26], %46 {strides = array<i32>} : memref<72x512xf32, #tpu.memory_space<vmem>>, vector<8x256xf32>,
    %c255_i32 = arith.constant 255 : i32
    %72 = tpu.dynamic_rotate %46 by %c255_i32 dim 1 : vector<8x256xf32>, i32 -> vector<8x256xf32>
    %cst_27 = arith.constant 0.000000e+00 : f32
    %73 = vector.broadcast %cst_27 : f32 to vector<8x256xf32>
    %74 = vector.shape_cast %32 : vector<1x256xi1> to vector<1x256xi1>
    %75 = vector.broadcast %74 : vector<1x256xi1> to vector<8x256xi1>
    %76 = arith.select %75, %72, %73 : vector<8x256xi1>, vector<8x256xf32>
    %c40 = arith.constant 40 : index
    %c0_28 = arith.constant 0 : index
    %77 = vector.load %arg6[%c40, %c0_28] : memref<72x512xf32, #tpu.memory_space<vmem>>, vector<8x256xf32>
    tpu.vector_store %arg6[%c40, %c0_28], %76 {strides = array<i32>} : memref<72x512xf32, #tpu.memory_space<vmem>>, vector<8x256xf32>,
    %c241_i32 = arith.constant 241 : i32
    %78 = tpu.dynamic_rotate %46 by %c241_i32 dim 1 : vector<8x256xf32>, i32 -> vector<8x256xf32>
    %cst_29 = arith.constant 0.000000e+00 : f32
    %79 = vector.broadcast %cst_29 : f32 to vector<8x256xf32>
    %80 = vector.shape_cast %37 : vector<1x256xi1> to vector<1x256xi1>
    %81 = vector.broadcast %80 : vector<1x256xi1> to vector<8x256xi1>
    %82 = arith.select %81, %78, %79 : vector<8x256xi1>, vector<8x256xf32>
    %c48 = arith.constant 48 : index
    %c0_30 = arith.constant 0 : index
    %83 = vector.load %arg6[%c48, %c0_30] : memref<72x512xf32, #tpu.memory_space<vmem>>, vector<8x256xf32>
    tpu.vector_store %arg6[%c48, %c0_30], %82 {strides = array<i32>} : memref<72x512xf32, #tpu.memory_space<vmem>>, vector<8x256xf32>,
    %c240_i32_31 = arith.constant 240 : i32
    %84 = tpu.dynamic_rotate %46 by %c240_i32_31 dim 1 : vector<8x256xf32>, i32 -> vector<8x256xf32>
    %cst_32 = arith.constant 0.000000e+00 : f32
    %85 = vector.broadcast %cst_32 : f32 to vector<8x256xf32>
    %86 = vector.shape_cast %39 : vector<1x256xi1> to vector<1x256xi1>
    %87 = vector.broadcast %86 : vector<1x256xi1> to vector<8x256xi1>
    %88 = arith.select %87, %84, %85 : vector<8x256xi1>, vector<8x256xf32>
    %c56 = arith.constant 56 : index
    %c0_33 = arith.constant 0 : index
    %89 = vector.load %arg6[%c56, %c0_33] : memref<72x512xf32, #tpu.memory_space<vmem>>, vector<8x256xf32>
    tpu.vector_store %arg6[%c56, %c0_33], %88 {strides = array<i32>} : memref<72x512xf32, #tpu.memory_space<vmem>>, vector<8x256xf32>,
    %c239_i32 = arith.constant 239 : i32
    %90 = tpu.dynamic_rotate %46 by %c239_i32 dim 1 : vector<8x256xf32>, i32 -> vector<8x256xf32>
    %cst_34 = arith.constant 0.000000e+00 : f32
    %91 = vector.broadcast %cst_34 : f32 to vector<8x256xf32>
    %92 = vector.shape_cast %44 : vector<1x256xi1> to vector<1x256xi1>
    %93 = vector.broadcast %92 : vector<1x256xi1> to vector<8x256xi1>
    %94 = arith.select %93, %90, %91 : vector<8x256xi1>, vector<8x256xf32>
    %c64 = arith.constant 64 : index
    %c0_35 = arith.constant 0 : index
    %95 = vector.load %arg6[%c64, %c0_35] : memref<72x512xf32, #tpu.memory_space<vmem>>, vector<8x256xf32>
    tpu.vector_store %arg6[%c64, %c0_35], %94 {strides = array<i32>} : memref<72x512xf32, #tpu.memory_space<vmem>>, vector<8x256xf32>,
    %c1 = arith.constant 1 : index
    %c0_36 = arith.constant 0 : index
    %c0_37 = arith.constant 0 : index
    %96 = vector.load %arg1[%c1, %c0_36, %c0_37] : memref<2x8x256xf32, #tpu.memory_space<vmem>>, vector<1x8x256xf32>
    %97 = vector.shape_cast %96 : vector<1x8x256xf32> to vector<8x256xf32>
    %c17_i32_38 = arith.constant 17 : i32
    %98 = tpu.dynamic_rotate %97 by %c17_i32_38 dim 1 : vector<8x256xf32>, i32 -> vector<8x256xf32>
    %cst_39 = arith.constant 0.000000e+00 : f32
    %99 = vector.broadcast %cst_39 : f32 to vector<8x256xf32>
    %100 = vector.shape_cast %21 : vector<1x256xi1> to vector<1x256xi1>
    %101 = vector.broadcast %100 : vector<1x256xi1> to vector<8x256xi1>
    %102 = arith.select %101, %98, %99 : vector<8x256xi1>, vector<8x256xf32>
    %c0_40 = arith.constant 0 : index
    %c256 = arith.constant 256 : index
    %103 = vector.load %arg6[%c0_40, %c256] : memref<72x512xf32, #tpu.memory_space<vmem>>, vector<8x256xf32>
    tpu.vector_store %arg6[%c0_40, %c256], %102 {strides = array<i32>} : memref<72x512xf32, #tpu.memory_space<vmem>>, vector<8x256xf32>,
    %c16_i32_41 = arith.constant 16 : i32
    %104 = tpu.dynamic_rotate %97 by %c16_i32_41 dim 1 : vector<8x256xf32>, i32 -> vector<8x256xf32>
    %cst_42 = arith.constant 0.000000e+00 : f32
    %105 = vector.broadcast %cst_42 : f32 to vector<8x256xf32>
    %106 = vector.shape_cast %23 : vector<1x256xi1> to vector<1x256xi1>
    %107 = vector.broadcast %106 : vector<1x256xi1> to vector<8x256xi1>
    %108 = arith.select %107, %104, %105 : vector<8x256xi1>, vector<8x256xf32>
    %c8_43 = arith.constant 8 : index
    %c256_44 = arith.constant 256 : index
    %109 = vector.load %arg6[%c8_43, %c256_44] : memref<72x512xf32, #tpu.memory_space<vmem>>, vector<8x256xf32>
    tpu.vector_store %arg6[%c8_43, %c256_44], %108 {strides = array<i32>} : memref<72x512xf32, #tpu.memory_space<vmem>>, vector<8x256xf32>,
    %c15_i32_45 = arith.constant 15 : i32
    %110 = tpu.dynamic_rotate %97 by %c15_i32_45 dim 1 : vector<8x256xf32>, i32 -> vector<8x256xf32>
    %cst_46 = arith.constant 0.000000e+00 : f32
    %111 = vector.broadcast %cst_46 : f32 to vector<8x256xf32>
    %112 = vector.shape_cast %28 : vector<1x256xi1> to vector<1x256xi1>
    %113 = vector.broadcast %112 : vector<1x256xi1> to vector<8x256xi1>
    %114 = arith.select %113, %110, %111 : vector<8x256xi1>, vector<8x256xf32>
    %c16_47 = arith.constant 16 : index
    %c256_48 = arith.constant 256 : index
    %115 = vector.load %arg6[%c16_47, %c256_48] : memref<72x512xf32, #tpu.memory_space<vmem>>, vector<8x256xf32>
    tpu.vector_store %arg6[%c16_47, %c256_48], %114 {strides = array<i32>} : memref<72x512xf32, #tpu.memory_space<vmem>>, vector<8x256xf32>,
    %c1_i32_49 = arith.constant 1 : i32
    %116 = tpu.dynamic_rotate %97 by %c1_i32_49 dim 1 : vector<8x256xf32>, i32 -> vector<8x256xf32>
    %cst_50 = arith.constant 0.000000e+00 : f32
    %117 = vector.broadcast %cst_50 : f32 to vector<8x256xf32>
    %118 = vector.shape_cast %30 : vector<1x256xi1> to vector<1x256xi1>
    %119 = vector.broadcast %118 : vector<1x256xi1> to vector<8x256xi1>
    %120 = arith.select %119, %116, %117 : vector<8x256xi1>, vector<8x256xf32>
    %c24_51 = arith.constant 24 : index
    %c256_52 = arith.constant 256 : index
    %121 = vector.load %arg6[%c24_51, %c256_52] : memref<72x512xf32, #tpu.memory_space<vmem>>, vector<8x256xf32>
    tpu.vector_store %arg6[%c24_51, %c256_52], %120 {strides = array<i32>} : memref<72x512xf32, #tpu.memory_space<vmem>>, vector<8x256xf32>,
    %c32_53 = arith.constant 32 : index
    %c256_54 = arith.constant 256 : index
    %122 = vector.load %arg6[%c32_53, %c256_54] : memref<72x512xf32, #tpu.memory_space<vmem>>, vector<8x256xf32>
    tpu.vector_store %arg6[%c32_53, %c256_54], %97 {strides = array<i32>} : memref<72x512xf32, #tpu.memory_space<vmem>>, vector<8x256xf32>,
    %c255_i32_55 = arith.constant 255 : i32
    %123 = tpu.dynamic_rotate %97 by %c255_i32_55 dim 1 : vector<8x256xf32>, i32 -> vector<8x256xf32>
    %cst_56 = arith.constant 0.000000e+00 : f32
    %124 = vector.broadcast %cst_56 : f32 to vector<8x256xf32>
    %125 = vector.shape_cast %32 : vector<1x256xi1> to vector<1x256xi1>
    %126 = vector.broadcast %125 : vector<1x256xi1> to vector<8x256xi1>
    %127 = arith.select %126, %123, %124 : vector<8x256xi1>, vector<8x256xf32>
    %c40_57 = arith.constant 40 : index
    %c256_58 = arith.constant 256 : index
    %128 = vector.load %arg6[%c40_57, %c256_58] : memref<72x512xf32, #tpu.memory_space<vmem>>, vector<8x256xf32>
    tpu.vector_store %arg6[%c40_57, %c256_58], %127 {strides = array<i32>} : memref<72x512xf32, #tpu.memory_space<vmem>>, vector<8x256xf32>,
    %c241_i32_59 = arith.constant 241 : i32
    %129 = tpu.dynamic_rotate %97 by %c241_i32_59 dim 1 : vector<8x256xf32>, i32 -> vector<8x256xf32>
    %cst_60 = arith.constant 0.000000e+00 : f32
    %130 = vector.broadcast %cst_60 : f32 to vector<8x256xf32>
    %131 = vector.shape_cast %37 : vector<1x256xi1> to vector<1x256xi1>
    %132 = vector.broadcast %131 : vector<1x256xi1> to vector<8x256xi1>
    %133 = arith.select %132, %129, %130 : vector<8x256xi1>, vector<8x256xf32>
    %c48_61 = arith.constant 48 : index
    %c256_62 = arith.constant 256 : index
    %134 = vector.load %arg6[%c48_61, %c256_62] : memref<72x512xf32, #tpu.memory_space<vmem>>, vector<8x256xf32>
    tpu.vector_store %arg6[%c48_61, %c256_62], %133 {strides = array<i32>} : memref<72x512xf32, #tpu.memory_space<vmem>>, vector<8x256xf32>,
    %c240_i32_63 = arith.constant 240 : i32
    %135 = tpu.dynamic_rotate %97 by %c240_i32_63 dim 1 : vector<8x256xf32>, i32 -> vector<8x256xf32>
    %cst_64 = arith.constant 0.000000e+00 : f32
    %136 = vector.broadcast %cst_64 : f32 to vector<8x256xf32>
    %137 = vector.shape_cast %39 : vector<1x256xi1> to vector<1x256xi1>
    %138 = vector.broadcast %137 : vector<1x256xi1> to vector<8x256xi1>
    %139 = arith.select %138, %135, %136 : vector<8x256xi1>, vector<8x256xf32>
    %c56_65 = arith.constant 56 : index
    %c256_66 = arith.constant 256 : index
    %140 = vector.load %arg6[%c56_65, %c256_66] : memref<72x512xf32, #tpu.memory_space<vmem>>, vector<8x256xf32>
    tpu.vector_store %arg6[%c56_65, %c256_66], %139 {strides = array<i32>} : memref<72x512xf32, #tpu.memory_space<vmem>>, vector<8x256xf32>,
    %c239_i32_67 = arith.constant 239 : i32
    %141 = tpu.dynamic_rotate %97 by %c239_i32_67 dim 1 : vector<8x256xf32>, i32 -> vector<8x256xf32>
    %cst_68 = arith.constant 0.000000e+00 : f32
    %142 = vector.broadcast %cst_68 : f32 to vector<8x256xf32>
    %143 = vector.shape_cast %44 : vector<1x256xi1> to vector<1x256xi1>
    %144 = vector.broadcast %143 : vector<1x256xi1> to vector<8x256xi1>
    %145 = arith.select %144, %141, %142 : vector<8x256xi1>, vector<8x256xf32>
    %c64_69 = arith.constant 64 : index
    %c256_70 = arith.constant 256 : index
    %146 = vector.load %arg6[%c64_69, %c256_70] : memref<72x512xf32, #tpu.memory_space<vmem>>, vector<8x256xf32>
    tpu.vector_store %arg6[%c64_69, %c256_70], %145 {strides = array<i32>} : memref<72x512xf32, #tpu.memory_space<vmem>>, vector<8x256xf32>,
    %c0_71 = arith.constant 0 : index
    %c0_72 = arith.constant 0 : index
    %147 = vector.load %arg2[%c0_71, %c0_72] : memref<8x72xf32, #tpu.memory_space<vmem>>, vector<8x72xf32>
    %c0_73 = arith.constant 0 : index
    %c0_74 = arith.constant 0 : index
    %148 = vector.load %arg6[%c0_73, %c0_74] : memref<72x512xf32, #tpu.memory_space<vmem>>, vector<72x512xf32>
    %cst_75 = arith.constant dense<0.000000e+00> : vector<8x512xf32>
    %149 = tpu.matmul %147, %148, %cst_75 {dimension_numbers = #tpu.dot_dimension_numbers<[1], [0], [0], [1], [0, 0, 1, 1], [], []>} : vector<8x72xf32>, vector<72x512xf32>, vector<8x512xf32> -> vector<8x512xf32>
    %c0_76 = arith.constant 0 : index
    %c0_77 = arith.constant 0 : index
    %150 = vector.load %arg3[%c0_76, %c0_77] : memref<8x1xf32, #tpu.memory_space<vmem>>, vector<8x1xf32>
    %151 = vector.broadcast %150 : vector<8x1xf32> to vector<8x512xf32>
    %152 = arith.addf %149, %151 : vector<8x512xf32>
    %c0_78 = arith.constant 0 : index
    %153 = memref.load %arg4[%c0_78] : memref<1xf32, #tpu.memory_space<smem>>
    %cst_79 = arith.constant 0.000000e+00 : f32
    %154 = vector.broadcast %cst_79 : f32 to vector<8x512xf32>
    %155 = arith.cmpf ogt, %152, %154 : vector<8x512xf32>
    %156 = vector.broadcast %153 : f32 to vector<8x512xf32>
    %157 = arith.mulf %156, %152 : vector<8x512xf32>
    %158 = arith.select %155, %152, %157 : vector<8x512xi1>, vector<8x512xf32>
    %159 = vector.extract_strided_slice %158 {offsets = [0, 0], sizes = [8, 256], strides = [1, 1]} : vector<8x512xf32> to vector<8x256xf32>
    %c0_80 = arith.constant 0 : index
    %c0_81 = arith.constant 0 : index
    %c0_82 = arith.constant 0 : index
    %160 = vector.load %arg5[%c0_80, %c0_81, %c0_82] : memref<2x8x256xf32, #tpu.memory_space<vmem>>, vector<1x8x256xf32>
    %161 = vector.shape_cast %160 : vector<1x8x256xf32> to vector<8x256xf32>
    %162 = vector.shape_cast %159 : vector<8x256xf32> to vector<1x8x256xf32>
    tpu.vector_store %arg5[%c0_80, %c0_81, %c0_82], %162 {strides = array<i32>} : memref<2x8x256xf32, #tpu.memory_space<vmem>>, vector<1x8x256xf32>,
    %163 = vector.extract_strided_slice %158 {offsets = [0, 256], sizes = [8, 256], strides = [1, 1]} : vector<8x512xf32> to vector<8x256xf32>
    %c1_83 = arith.constant 1 : index
    %c0_84 = arith.constant 0 : index
    %c0_85 = arith.constant 0 : index
    %164 = vector.load %arg5[%c1_83, %c0_84, %c0_85] : memref<2x8x256xf32, #tpu.memory_space<vmem>>, vector<1x8x256xf32>
    %165 = vector.shape_cast %164 : vector<1x8x256xf32> to vector<8x256xf32>
    %166 = vector.shape_cast %163 : vector<8x256xf32> to vector<1x8x256xf32>
    tpu.vector_store %arg5[%c1_83, %c0_84, %c0_85], %166 {strides = array<i32>} : memref<2x8x256xf32, #tpu.memory_space<vmem>>, vector<1x8x256xf32>,
    return
  }
  func.func @transform_0(%arg0: i32) -> (i32, i32, i32) {
    %c0_i32 = arith.constant 0 : i32
    %c0_i32_0 = arith.constant 0 : i32
    %c0_i32_1 = arith.constant 0 : i32
    return %arg0, %c0_i32, %c0_i32_0 : i32, i32, i32
  }
  func.func @transform_1(%arg0: i32) -> (i32, i32) {
    %c0_i32 = arith.constant 0 : i32
    %c0_i32_0 = arith.constant 0 : i32
    %c0_i32_1 = arith.constant 0 : i32
    return %c0_i32, %c0_i32_0 : i32, i32
  }
  func.func @transform_2(%arg0: i32) -> (i32, i32) {
    %c0_i32 = arith.constant 0 : i32
    %c0_i32_0 = arith.constant 0 : i32
    %c0_i32_1 = arith.constant 0 : i32
    return %c0_i32, %c0_i32_0 : i32, i32
  }
  func.func @transform_3(%arg0: i32) -> i32 {
    %c0_i32 = arith.constant 0 : i32
    %c0_i32_0 = arith.constant 0 : i32
    return %c0_i32 : i32
  }
  func.func @transform_4(%arg0: i32) -> (i32, i32, i32) {
    %c0_i32 = arith.constant 0 : i32
    %c0_i32_0 = arith.constant 0 : i32
    %c0_i32_1 = arith.constant 0 : i32
    return %arg0, %c0_i32, %c0_i32_0 : i32, i32, i32
  }
}

</mosaic_0001>

<bundles_post_ra>
// kernel: tpu_custom_call.1
= control target key start
LH: loop header
LB: loop body
LE: loop exit
PB: predicated region body
PF: predicated region fallthrough
CT: control target
= control target key end

     0   :  { %s1565_s0 = inlined_call_operand.hbm [shape: f32[4,8,256], index: 0, kind: input, shape index: {}]   ;;  %s1566_s1 = inlined_call_operand.vmem [shape: f32[8,72], index: 1, kind: input, shape index: {}]   ;;  %s1567_s2 = inlined_call_operand.vmem [shape: f32[8,1], index: 2, kind: input, shape index: {}]   ;;  %s1568_s3 = inlined_call_operand.<no memory space> [shape: f32[1], index: 3, kind: input, shape index: {}]   ;;  %s1569_s4 = inlined_call_operand.hbm [shape: f32[4,8,256], index: 4, kind: output, shape index: {}]  }
   0x1   :  { %9 = sst [smem:[#allocation3]] %s1568_s3 }
   0x2   :  { %10 = vsyncpa [#allocation5], 0 }
   0x3   :  { %12 = vsyncpa [#allocation5 + $0x1], 0 }
   0x4   :  { %13 = vsyncpa [#allocation6], 0 }
   0x5   :  { %15 = vsyncpa [#allocation6 + $0x1], 0  ;;  %s1143_s17 = smov 0   ;;  %s1145_s18 = smov 0  }
   0x6   :  { %s1147_s19 = smov 0   ;;  %s1149_s20 = smov 0  }
   0x7 LB: > { %s1164_s3 = sadd.s32 4294967295, %s1097_s20   ;;  %s768_s21 = sadd.s32 4294967294, %s1097_s20   ;;  %s1097_s20 = sphi %s1149_s20, %s1608_s20   ;;  %s1093_s19 = sphi %s1147_s19, %s1607_s19   ;;  %s1089_s18 = sphi %s1145_s18, %s1606_s18   ;;  %s1085_s17 = sphi %s1143_s17, %s1605_s17  }
   0x8   : > { %s1168_s22 = sadd.s32 1, %s1097_s20   ;;  %s28_s23 = sadd.s32 1, %s1093_s19 }
   0x9   : > { %s25_s24 = ssub.s32 %s1097_s20, %s1168_s22  ;;  %p35_p0 = scmp.ne.s32.totalorder %s1093_s19, %s1089_s18 }
   0xa   : > { %p26_p1 = scmp.eq.s32.totalorder %s25_s24, 0  ;;  %p36_p2 = scmp.eq.s32.totalorder %s1097_s20, 0 }
   0xb   : > { %p41_p3 = scmp.ne.s32.totalorder %s1089_s18, %s1085_s17  ;;  %p42_p4 = scmp.eq.s32.totalorder %s1164_s3, 0 }
   0xc   : > { %s1180_s25 = scalar_select %p26_p1, %s1093_s19, %s28_s23  }
   0xd   : > { %p1182_p5 = por %p36_p2, %p35_p0  ;;  %p1186_p6 = por %p42_p4, %p41_p3 }
   0xe   : > { %p128_p7 = scmp.eq.s32.totalorder %s1164_s3, 1  ;;  %p134_p8 = scmp.eq.s32.totalorder %s768_s21, 1 }
   0xf   : > { %p882_p10 = scmp.lt.s32.totalorder %s1097_s20, 2  ;;  %s163_s30 = sand.u32 1, %s1093_s19  }
  0x10   : > { %p1193_p11 = por %p128_p7, %p35_p0  ;;  %p1197_p12 = por %p134_p8, %p41_p3 }
  0x11   : > { %s791_s5 = sshll.u32 %s1097_s20, 9  ;;  %s771_s6 = sshll.u32 %s163_s30, 5 }
  0x12   : > { %s1573_s28 = scalar_select %p1193_p11, 1, 0 }
  0x13   : > { %s1574_s29 = scalar_select %p1197_p12, 1, 0 }
  0x14   : > { %s1206_s9 = scalar_lea.hbm %s1565_s0, %s791_s5  ;;  %s167_s10 = scalar_lea.vmem [#allocation4], %s771_s6 }
  0x15   : > { %s175_s11 = sshll.u32 %s167_s10, 4  ;;  %p1210_p13 = pnand %p882_p10, %p1182_p5  ;;  %s1214_s11 = int_to_ptr.vmem [resolvable:$true] %s175_s11 }
  0x16   : > { %s1216_s13 = scalar_lea.sflag [#allocation5], %s163_s30  ;;  %s1001_s14 = scalar_lea.hbm %s1206_s9, 512 }
  0x17   : > { %p1002_p0 = scmp.ne.s32.totalorder %s1206_s9, %s1001_s14  ;;  %p1003_p1 = pneg %p1210_p13 }
  0x18   : > { %s1006_s21 = scalar_lea.hbm %s1565_s0, 1024  ;;  %p1007_p4 = scmp.lt.u32.totalorder %s1206_s9, %s1565_s0 }
  0x19   : > { %p1004_p2 = pnand %p1003_p1, %p1002_p0  ;;  %p1008_p5 = scmp.lt.u32.totalorder %s1006_s21, %s1001_s14 }
  0x1a   : > { %p1010_p8 = scmp.lt.u32.totalorder %s1001_s14, %s1206_s9 }
  0x1b   : > { %p1005_p3 = pneg %p1004_p2  ;;  %p1009_p7 = por %p1008_p5, %p1007_p4 }
  0x1d   : > { %p1011_p10 = por %p1010_p8, %p1009_p7 }
  0x1f   : > { %p1012_p9 = pnand %p1011_p10, %p1005_p3 }
  0x21   : > { %1015 = shalt.err (!%p1012_p9)
}
  0x22   : > { %s1016_s26 = scalar_lea.vmem %s1214_s11, 512  ;;  %s1099_s30 = smov [#allocation4]  }
  0x23   : > { %p1017_p0 = scmp.ne.s32.totalorder %s1214_s11, %s1016_s26  ;;  %s1021_s5 = sshll.u32 %s1099_s30, 4  ;;  %s1022_s5 = int_to_ptr.vmem [resolvable:$false] %s1021_s5 }
  0x24   : > { %s1023_s6 = scalar_lea.vmem %s1022_s5, 1024  ;;  %p1024_p11 = scmp.lt.s32.totalorder %s1214_s11, %s1022_s5 }
  0x25   : > { %p1019_p2 = pnand %p1017_p0, %p1003_p1  ;;  %p1025_p4 = scmp.lt.s32.totalorder %s1023_s6, %s1016_s26 }
  0x27   : > { %p1020_p12 = pneg %p1019_p2  ;;  %p1026_p5 = por %p1025_p4, %p1024_p11 }
  0x29   : > { %p1027_p7 = pnand %p1026_p5, %p1020_p12 }
  0x2b   : > { %1030 = shalt.err (!%p1027_p7)
}
  0x2c   : > { %s1100_s7 = smov 256   ;;  %s1101_s8 = smov 16  }
  0x2d   : > { %877 = dma.hbm_to_vmem [thread:$0]  (!%p1210_p13), %s1206_s9, 512, %s1214_s11, %s1216_s13, %s1100_s7, %s1100_s7, %s1101_s8  }
  0x2e   : > { %p775_p9 = scmp.ge.s32.totalorder %s1097_s20, 1  ;;  %p183_p1 = scmp.lt.s32.totalorder %s1097_s20, 3 }
  0x30   : > { %p184_p3 = pnand %p775_p9, %p183_p1 }
  0x31   : > { %s1247_s10 = sand.u32 (!%p184_p3), 1, %s1089_s18  }
  0x32   : > { %187 = sbr.rel (%p184_p3) target bundleno = 445 (0x1bd), region = 36  ;;  %s776_s14 = sshll.u32 (!%p184_p3), %s1247_s10, 5 }
  0x33   : > { %s190_s15 = scalar_lea.sflag (!%p184_p3), [#allocation5], %s1247_s10  ;;  %s193_s16 = scalar_lea.vmem (!%p184_p3), [#allocation4], %s776_s14 }
  0x39   : > { %1076 = dma.done.wait (%p1186_p6), %s190_s15, 512  }
  0x3a   : > { %1078 = vsyncadd (%p1186_p6), %s190_s15, 4294966784  ;;  %v1257_v0 = vld [vmem:[%s193_s16 + $0x10] sm:$0xff]  ;;  %v1259_v1 = vld [vmem:[%s193_s16 + $0x18] sm:$0xff]  ;;  %s1102_s9 = smov 17   ;;  %s1103_s11 = smov 16   ;;  %v1107_v6 = vmov 0.0   ;;  %v220_v9 = vlaneseq }
  0x3b   : > { %v1261_v2 = vld [vmem:[%s193_s16] sm:$0xff]  ;;  %v940_v3 = vpack.i.bf16 %v1259_v1, %v1257_v0  ;;  %v1265_v4 = vld [vmem:[%s193_s16 + $0x8] sm:$0xff]  ;;  %s1104_s27 = smov 1   ;;  %s1105_s12 = smov 15   ;;  %583 = vmatprep.mubr.f32.mxu0 %v1107_v6  ;;  %654 = vmatprep.mubr.f32.mxu1 %v1107_v6  ;;  %v1110_v7 = vmov 0   ;;  %vm1112_vm10 = vmmov 1  }
  0x3c   : > { %v930_v5 = vpack.i.bf16 %v1265_v4, %v1261_v2  ;;  %s1106_s13 = smov 127   ;;  %s1108_s21 = smov 112   ;;  %1000 = vset.pattern.permute.xlu0 %v1110_v7  ;;  %v509_v8 = vld [vmem:[%s1567_s2] sm:$0xff]  ;;  %v1278_v10 = vand.u32 127, %v220_v9 }
  0x3d   : > { %941 = vrot.lane.b32.xlu1 %v940_v3, %s1102_s9  ;;  %s1109_s23 = smov 113   ;;  %s1111_s24 = smov 111  }
  0x3e   : > { %931 = vrot.lane.b32.xlu0 %v930_v5, %s1102_s9  ;;  %v1281_v11 = vadd.s32 128, %v1278_v10  ;;  %v227_v12 = vand.u32 15, %v1278_v10  ;;  %vm247_vm0 = vcmp.ge.s32.totalorder %v1278_v10, 16  ;;  %vm314_vm2 = vcmp.lt.s32.totalorder %v1278_v10, 1  ;;  %s661_s7 = sld [smem:[#allocation3]]  ;;  %s217_s8 = scalar_lea.vmem [#allocation7], %s776_s14 }
  0x3f   : > { %vm269_vm3 = vcmp.lt.s32.totalorder %v1278_v10, 17  ;;  %vm299_vm4 = vcmp.lt.s32.totalorder %v1278_v10, 15  ;;  %vm284_vm6 = vcmp.lt.s32.totalorder %v1278_v10, 16  ;;  %s695_s15 = sshll.u32 %s217_s8, 4  ;;  %s793_s16 = sshll.u32 %s1164_s3, 9  ;;  %s1515_s15 = int_to_ptr.vmem [resolvable:$true] %s695_s15 }
  0x40   : > { %v234_v14 = vand.u32 15, %v1281_v11  ;;  %vm1286_vm1 = vcmp.ge.s32.totalorder %v227_v12, 1  ;;  %vm1310_vm9 = vcmp.lt.s32.totalorder %v227_v12, 15  ;;  %s681_s3 = scalar_lea.sflag [#allocation6], %s1247_s10  ;;  %p1602_p11 = scmp.ne.s32.totalorder %s1573_s28, 0 }
  0x41   : > { %946 = vrot.lane.b32.xlu1 %v940_v3, %s1103_s11  ;;  %vm1302_vm7 = vmand %vm247_vm0, %vm1286_vm1 }
  0x42   : > { %936 = vrot.lane.b32.xlu0 %v930_v5, %s1103_s11  ;;  %vm1293_vm5 = vcmp.ge.s32.totalorder %v234_v14, 1  ;;  %vm1306_vm8 = vcmp.lt.s32.totalorder %v234_v14, 15  ;;  %vm1341_vm12 = vmpackc.low %vm247_vm0, %vm1302_vm7 }
  0x43   : > { %vm1323_vm11 = vmpackc.low %vm1112_vm10, %vm1293_vm5 }
  0x44   : > { %vm1351_vm13 = vmand %vm247_vm0, %vm1310_vm9  ;;  %vm331_vm0 = vcmp.lt.s32.totalorder %v1278_v10, 127 }
  0x45   : > { %956 = vrot.lane.b32.xlu1 %v930_v5, %s1104_s27  ;;  %vm829_vm14 = vmpackc.low %vm1293_vm5, %vm1306_vm8 }
  0x46   : > { %951 = vrot.lane.b32.xlu0 %v930_v5, %s1105_s12  ;;  %vm832_vm15 = vmpackc.low %vm1286_vm1, %vm1351_vm13  ;;  %vm376_vm13 = vcmp.lt.s32.totalorder %v1278_v10, 111 }
  0x47   : > { %vm1429_vm7 = vmpackc.low %vm1310_vm9, %vm1112_vm10 }
  0x49   : > { %966 = vrot.lane.b32.xlu1 %v940_v3, %s1104_s27  ;;  %s1520_s27 = scalar_lea.hbm %s1569_s4, %s793_s16 }
  0x4a   : > { %961 = vrot.lane.b32.xlu0 %v940_v3, %s1105_s12  ;;  %s1031_s12 = scalar_lea.vmem %s1515_s15, 512 }
  0x4b   : > { %p1032_p6 = scmp.ne.s32.totalorder %s1515_s15, %s1031_s12 }
  0x4d   : > { %976 = vrot.lane.b32.xlu1 %v940_v3, %s1106_s13  ;;  %p1033_p12 = pnand %p1032_p6, %p1602_p11 }
  0x4e   : > { %971 = vrot.lane.b32.xlu0 %v930_v5, %s1106_s13  ;;  %s1113_s13 = smov [#allocation7]  }
  0x4f   : > { %p1034_p13 = pneg %p1033_p12 }
  0x51   : > { %986 = vrot.lane.b32.xlu1 %v930_v5, %s1108_s21 }
  0x52   : > { %981 = vrot.lane.b32.xlu0 %v930_v5, %s1109_s23 }
  0x55   : > { %996 = vrot.lane.b32.xlu1 %v940_v3, %s1108_s21  ;;  %s1035_s21 = sshll.u32 %s1113_s13, 4  ;;  %s1036_s21 = int_to_ptr.vmem [resolvable:$false] %s1035_s21 }
  0x56   : > { %991 = vrot.lane.b32.xlu0 %v940_v3, %s1109_s23  ;;  %s1037_s23 = scalar_lea.vmem %s1036_s21, 1024  ;;  %p1038_p8 = scmp.lt.s32.totalorder %s1515_s15, %s1036_s21 }
  0x57   : > { %p1039_p10 = scmp.lt.s32.totalorder %s1037_s23, %s1031_s12 }
  0x59   : > { %374 = vrot.lane.b32.xlu1 %v1265_v4, %s1111_s24  ;;  %p1040_p0 = por %p1039_p10, %p1038_p8 }
  0x5a   : > { %372 = vrot.lane.b32.xlu0 %v1261_v2, %s1111_s24 }
  0x5b   : > { %p1041_p2 = pnand %p1040_p0, %p1034_p13 }
  0x5d   : > { %464 = vrot.lane.b32.xlu1 %v1259_v1, %s1111_s24 }
  0x5e   : > { %462 = vrot.lane.b32.xlu0 %v1257_v0, %s1111_s24 }
  0x62   : > { %512 = vperm.xlu0 %1000, %v509_v8  }
  0xaf   : > { %v942_v13 = vpop.permute.xlu1 %941 }
  0xb0   : > { %v932_v15 = vpop.permute.xlu0 %931  ;;  %v944_v16 = vunpack.i.h.bf16 %v942_v13  ;;  %v943_v17 = vunpack.i.l.bf16 %v942_v13 }
  0xb1   : > { %v934_v19 = vunpack.i.h.bf16 %v932_v15  ;;  %v933_v20 = vunpack.i.l.bf16 %v932_v15 }
  0xb2   : > { %v394_v31 = vsel %vm269_vm3, %v943_v17, %v944_v16  ;;  %v395_v32 = vsel %vm269_vm3, %v944_v16, %v943_v17 }
  0xb3   : > { %v947_v21 = vpop.permute.xlu1 %946  ;;  %v270_v33 = vsel %vm269_vm3, %v933_v20, %v934_v19  ;;  %v271_v36 = vsel %vm269_vm3, %v934_v19, %v933_v20  ;;  %vm361_vm3 = vcmp.lt.s32.totalorder %v1278_v10, 112 }
  0xb4   : > { %v949_v23 = vunpack.i.h.bf16 %v947_v21  ;;  %v948_v24 = vunpack.i.l.bf16 %v947_v21  ;;  %v937_v25 = vpop.permute.xlu0 %936 }
  0xb5   : > { %v939_v29 = vunpack.i.h.bf16 %v937_v25  ;;  %v938_v30 = vunpack.i.l.bf16 %v937_v25 }
  0xb6   : > { %v404_v35 = vsel %vm284_vm6, %v948_v24, %v949_v23  ;;  %v405_v37 = vsel %vm284_vm6, %v949_v23, %v948_v24 }
  0xb7   : > { %v957_v38 = vpop.permute.xlu1 %956  ;;  %v285_v39 = vsel %vm284_vm6, %v938_v30, %v939_v29  ;;  %v846_v40 = vpack.c.bf16 %v404_v35, %v394_v31  ;;  %v286_v41 = vsel %vm284_vm6, %v939_v29, %v938_v30  ;;  %v849_v43 = vpack.c.bf16 %v405_v37, %v395_v32  ;;  %vm1411_vm6 = vmpackc.low %vm1306_vm8, %vm1112_vm10 }
  0xb8   : > { %v959_v44 = vunpack.i.h.bf16 %v957_v38  ;;  %v958_v45 = vunpack.i.l.bf16 %v957_v38  ;;  %v952_v46 = vpop.permute.xlu0 %951  ;;  %v822_v47 = vpack.c.bf16 %v285_v39, %v270_v33  ;;  %v825_v48 = vpack.c.bf16 %v286_v41, %v271_v36 }
  0xb9   : > { %v954_v49 = vunpack.i.h.bf16 %v952_v46  ;;  %v953_v50 = vunpack.i.l.bf16 %v952_v46  ;;  %848 = vmatprep.subr.msk.bf16.mxu1 %vm1323_vm11, %v846_v40 }
  0xba   : > { %v315_v52 = vsel %vm314_vm2, %v958_v45, %v959_v44  ;;  %v316_v53 = vsel %vm314_vm2, %v959_v44, %v958_v45  ;;  %824 = vmatprep.subr.msk.bf16.mxu0 %vm1323_vm11, %v822_v47  ;;  %851 = vmatpush1.bf16.msk.msra.mxu1 %vm1341_vm12, %v849_v43 }
  0xbb   : > { %v300_v54 = vsel %vm299_vm4, %v953_v50, %v954_v49  ;;  %v301_v55 = vsel %vm299_vm4, %v954_v49, %v953_v50  ;;  %827 = vmatpush1.bf16.msk.msra.mxu0 %vm1341_vm12, %v825_v48  ;;  %v967_v56 = vpop.permute.xlu1 %966  ;;  %vm1464_vm12 = vmpackc.low %vm1112_vm10, %vm1286_vm1  ;;  %vm515_vm10 = vcmask 588800  }
  0xbc   : > { %v828_v57 = vpack.c.bf16 %v315_v52, %v300_v54  ;;  %v831_v58 = vpack.c.bf16 %v316_v53, %v301_v55  ;;  %v969_v59 = vunpack.i.h.bf16 %v967_v56  ;;  %v968_v60 = vunpack.i.l.bf16 %v967_v56  ;;  %v962_v61 = vpop.permute.xlu0 %961 }
  0xbd   : > { %v964_v62 = vunpack.i.h.bf16 %v962_v61  ;;  %v963_v63 = vunpack.i.l.bf16 %v962_v61 }
  0xbe   : > { %v424_v3 = vsel %vm314_vm2, %v968_v60, %v969_v59  ;;  %v425_v5 = vsel %vm314_vm2, %v969_v59, %v968_v60  ;;  %830 = vmatprep.subr.msk.bf16.mxu0 %vm829_vm14, %v828_v57  ;;  %vm258_vm2 = vcmp.lt.s32.totalorder %v1281_v11, 240  ;;  %v472_v57 = vld [vmem:[%s1566_s1] sm:$0xff] }
  0xbf   : > { %v414_v6 = vsel %vm299_vm4, %v963_v63, %v964_v62  ;;  %v415_v7 = vsel %vm299_vm4, %v964_v62, %v963_v63  ;;  %833 = vmatpush1.bf16.msk.msra.mxu0 %vm832_vm15, %v831_v58  ;;  %v977_v8 = vpop.permute.xlu1 %976  ;;  %vm346_vm4 = vcmp.lt.s32.totalorder %v1278_v10, 113  ;;  %vm260_vm11 = vmand %vm258_vm2, %vm1293_vm5  ;;  %v666_v62 = vstv %s661_s7 }
  0xc0   : > { %v852_v9 = vpack.c.bf16 %v424_v3, %v414_v6  ;;  %v855_v12 = vpack.c.bf16 %v425_v5, %v415_v7  ;;  %v979_v13 = vunpack.i.h.bf16 %v977_v8  ;;  %v978_v14 = vunpack.i.l.bf16 %v977_v8  ;;  %v972_v15 = vpop.permute.xlu0 %971  ;;  %vm1457_vm5 = vmpackc.low %vm258_vm2, %vm260_vm11 }
  0xc1   : > { %v974_v16 = vunpack.i.h.bf16 %v972_v15  ;;  %v973_v17 = vunpack.i.l.bf16 %v972_v15  ;;  %vm1485_vm1 = vmand %vm258_vm2, %vm1306_vm8 }
  0xc2   : > { %v436_v19 = vsel %vm331_vm0, %v978_v14, %v979_v13  ;;  %v437_v20 = vsel %vm331_vm0, %v979_v13, %v978_v14  ;;  %854 = vmatprep.subr.msk.bf16.mxu1 %vm829_vm14, %v852_v9 }
  0xc3   : > { %v858_v23 = vpack.c.bf16 %v437_v20, %v1259_v1  ;;  %v861_v24 = vpack.c.bf16 %v436_v19, %v1257_v0  ;;  %v332_v25 = vsel %vm331_vm0, %v973_v17, %v974_v16  ;;  %v333_v26 = vsel %vm331_vm0, %v974_v16, %v973_v17  ;;  %857 = vmatpush1.bf16.msk.msra.mxu1 %vm832_vm15, %v855_v12  ;;  %v987_v29 = vpop.permute.xlu1 %986 }
  0xc4   : > { %v834_v0 = vpack.c.bf16 %v333_v26, %v1265_v4  ;;  %v837_v30 = vpack.c.bf16 %v332_v25, %v1261_v2  ;;  %v989_v31 = vunpack.i.h.bf16 %v987_v29  ;;  %v988_v32 = vunpack.i.l.bf16 %v987_v29  ;;  %v982_v33 = vpop.permute.xlu0 %981 }
  0xc5   : > { %v984_v34 = vunpack.i.h.bf16 %v982_v33  ;;  %v983_v35 = vunpack.i.l.bf16 %v982_v33  ;;  %860 = vmatprep.subr.msk.bf16.mxu1 %vm1411_vm6, %v858_v23 }
  0xc6   : > { %v362_v36 = vsel %vm361_vm3, %v988_v32, %v989_v31  ;;  %v363_v4 = vsel %vm361_vm3, %v989_v31, %v988_v32  ;;  %836 = vmatprep.subr.msk.bf16.mxu0 %vm1411_vm6, %v834_v0 }
  0xc7   : > { %v347_v2 = vsel %vm346_vm4, %v983_v35, %v984_v34  ;;  %v348_v22 = vsel %vm346_vm4, %v984_v34, %v983_v35  ;;  %839 = vmatpush1.bf16.msk.msra.mxu0 %vm1429_vm7, %v837_v30  ;;  %863 = vmatpush1.bf16.msk.msra.mxu1 %vm1429_vm7, %v861_v24  ;;  %v997_v37 = vpop.permute.xlu1 %996 }
  0xc8   : > { %v840_v39 = vpack.c.bf16 %v363_v4, %v348_v22  ;;  %v843_v40 = vpack.c.bf16 %v362_v36, %v347_v2  ;;  %v999_v41 = vunpack.i.h.bf16 %v997_v37  ;;  %v998_v42 = vunpack.i.l.bf16 %v997_v37  ;;  %v992_v43 = vpop.permute.xlu0 %991 }
  0xc9   : > { %v994_v45 = vunpack.i.h.bf16 %v992_v43  ;;  %v993_v46 = vunpack.i.l.bf16 %v992_v43 }
  0xca   : > { %v456_v47 = vsel %vm361_vm3, %v998_v42, %v999_v41  ;;  %v457_v48 = vsel %vm361_vm3, %v999_v41, %v998_v42  ;;  %842 = vmatprep.subr.msk.bf16.mxu0 %vm1457_vm5, %v840_v39 }
  0xcb   : > { %v446_v18 = vsel %vm346_vm4, %v993_v46, %v994_v45  ;;  %v447_v49 = vsel %vm346_vm4, %v994_v45, %v993_v46  ;;  %845 = vmatpush1.bf16.msk.msra.mxu0 %vm1464_vm12, %v843_v40  ;;  %v375_v50 = vpop.permute.xlu1 %374 }
  0xcc   : > { %v864_v52 = vpack.c.bf16 %v457_v48, %v447_v49  ;;  %v867_v53 = vpack.c.bf16 %v456_v47, %v446_v18  ;;  %v373_v54 = vpop.permute.xlu0 %372 }
  0xcd   : > { %v377_v55 = vsel %vm376_vm13, %v373_v54, %v375_v50  ;;  %v378_v56 = vsel %vm376_vm13, %v375_v50, %v373_v54 }
  0xce   : > { %806 = vmatprep.subr.msk.mxu0 %vm1485_vm1, %v378_v56  ;;  %866 = vmatprep.subr.msk.bf16.mxu1 %vm1457_vm5, %v864_v52 }
  0xcf   : > { %807 = vmatpush1.msk.msra.mxu0 %vm1310_vm9, %v377_v55  ;;  %869 = vmatpush1.bf16.msk.msra.mxu1 %vm1464_vm12, %v867_v53  ;;  %v465_v11 = vpop.permute.xlu1 %464 }
  0xd0   : > { %v463_v27 = vpop.permute.xlu0 %462  ;;  %780 = vmatmul.mubr.msk.f32.vlgmr.msra.gmra.mrb[0].mxu0 %vm515_vm10, %v472_v57 }
  0xd1   : > { %v466_v58 = vsel %vm376_vm13, %v463_v27, %v465_v11  ;;  %v467_v59 = vsel %vm376_vm13, %v465_v11, %v463_v27 }
  0xd2   : > { %820 = vmatprep.subr.msk.mxu1 %vm1485_vm1, %v467_v59 }
  0xd3   : > { %821 = vmatpush1.msk.msra.mxu1 %vm1310_vm9, %v466_v58 }
  0xd4   : > { %781 = vmatmul.mubr.msk.f32.vlgmr.msra.gmra.mrb[0].mxu1 %vm515_vm10, %v472_v57 }
  0xe1   : > { %v513_v60 = vpop.permute.xlu0 %512 }
 0x1a3   : > { %v585_v61 = vpop.f32.mrb[0].mxu0 }
 0x1a4   : > { %v586_v63 = vadd.f32 %v585_v61, %v513_v60  ;;  %v587_v3 = vpop.f32.mrb[1].mxu0 }
 0x1a5   : > { %v588_v5 = vadd.f32 %v587_v3, %v513_v60 }
 0x1a6   : > { %vm662_vm8 = vcmp.gt.f32.partialorder %v586_v63, 0.0  ;;  %v667_v6 = vmul.f32 %v666_v62, %v586_v63 }
 0x1a7   : > { %vm663_vm14 = vcmp.gt.f32.partialorder %v588_v5, 0.0  ;;  %v668_v10 = vmul.f32 %v666_v62, %v588_v5  ;;  %v656_v7 = vpop.f32.mrb[0].mxu1 }
 0x1a8   : > { %v671_v8 = vsel %vm662_vm8, %v586_v63, %v667_v6  ;;  %v657_v28 = vadd.f32 %v656_v7, %v513_v60  ;;  %v658_v9 = vpop.f32.mrb[1].mxu1 }
 0x1a9   : > { %675 = vst [vmem:[%s217_s8] sm:$0xff] %v671_v8  ;;  %v672_v12 = vsel %vm663_vm14, %v588_v5, %v668_v10  ;;  %v659_v13 = vadd.f32 %v658_v9, %v513_v60 }
 0x1aa   : > { %676 = vst [vmem:[%s217_s8 + $0x8] sm:$0xff] %v672_v12  ;;  %vm664_vm9 = vcmp.gt.f32.partialorder %v657_v28, 0.0  ;;  %v669_v14 = vmul.f32 %v666_v62, %v657_v28 }
 0x1ab   : > { %vm665_vm15 = vcmp.gt.f32.partialorder %v659_v13, 0.0  ;;  %v670_v15 = vmul.f32 %v666_v62, %v659_v13 }
 0x1ac   : > { %v673_v16 = vsel %vm664_vm9, %v657_v28, %v669_v14 }
 0x1ad   : > { %782 = vst [vmem:[%s217_s8 + $0x10] sm:$0xff] %v673_v16  ;;  %v674_v17 = vsel %vm665_vm15, %v659_v13, %v670_v15 }
 0x1ae   : > { %783 = vst [vmem:[%s217_s8 + $0x18] sm:$0xff] %v674_v17 }
 0x1af   : > { %1044 = shalt.err (!%p1041_p2)
}
 0x1b0   : > { %s1045_s24 = scalar_lea.hbm %s1520_s27, 512  ;;  %s1049_s5 = scalar_lea.hbm %s1569_s4, 1024 }
 0x1b1   : > { %p1046_p4 = scmp.ne.s32.totalorder %s1520_s27, %s1045_s24  ;;  %p1050_p9 = scmp.lt.u32.totalorder %s1520_s27, %s1569_s4 }
 0x1b2   : > { %p1051_p1 = scmp.lt.u32.totalorder %s1049_s5, %s1045_s24  ;;  %p1053_p6 = scmp.lt.u32.totalorder %s1045_s24, %s1520_s27 }
 0x1b3   : > { %p1047_p5 = pnand %p1046_p4, %p1602_p11 }
 0x1b4   : > { %p1052_p3 = por %p1051_p1, %p1050_p9 }
 0x1b5   : > { %p1048_p7 = pneg %p1047_p5 }
 0x1b6   : > { %p1054_p12 = por %p1053_p6, %p1052_p3 }
 0x1b8   : > { %p1055_p13 = pnand %p1054_p12, %p1048_p7 }
 0x1ba   : > { %1058 = shalt.err (!%p1055_p13)
}
 0x1bb   : > { %s1114_s8 = smov 256  }
 0x1bc   : > { %872 = dma.vmem_to_hbm [thread:$0]  (%p1602_p11), %s1515_s15, 512, %s1520_s27, %s681_s3, %s1114_s8, %s1114_s8, %s1103_s11  }
 0x1bd PF: > { %s710_s16 = sand.u32 1, %s1085_s17   ;;  %p1603_p8 = scmp.ne.s32.totalorder %s1574_s29, 0 }
 0x1be   : > { %p1604_p10 = scmp.ge.s32.totalorder %s1097_s20, 2  ;;  %s711_s14 = scalar_lea.sflag [#allocation6], %s710_s16 }
 0x1c0   : > { %p879_p0 = pnand %p1604_p10, %p1603_p8 }
 0x1c2   : > { %1080 = dma.done.wait (!%p879_p0), %s711_s14, 512  }
 0x1c3   : > { %1082 = vsyncadd (!%p879_p0), %s711_s14, 4294966784  ;;  %p18_p2 = scmp.ge.s32.totalorder %s1168_s22, 4   ;;  %s1605_s17 = smov %s1089_s18 }
 0x1c4   : > { %s1606_s18 = smov %s1093_s19  ;;  %s1607_s19 = smov %s1180_s25 }
 0x1c5   : > { %s1608_s20 = smov %s1168_s22  ;;  %20 = sbr.rel (!%p18_p2) target bundleno = 7 (0x7), region = 83 }
 0x1cc   :  { %716 = vsyncpa [#allocation5], 1 }
 0x1cd   :  { %718 = vsyncpa [#allocation5 + $0x1], 1 }
 0x1ce   :  { %719 = vsyncpa [#allocation6], 1 }
 0x1cf   :  { %721 = vsyncpa [#allocation6 + $0x1], 1 }

</bundles_post_ra>
